<compile_context>
chip_gen: v7x
topology: tpu7x:2x2x1
jax: 0.10.0
libtpu: 0.0.40
codegen_flags: <defaults>
</compile_context>

<pallas_src>
import functools

import jax
import jax.numpy as jnp
import numpy as np
from jax import lax
from jax.experimental import pallas as pl
from jax.experimental.pallas import tpu as pltpu


def _subset_kernel(cls_ref, labels_ref, data_ref,            # inputs
                   out_data_ref, out_labels_ref, count_ref,  # outputs
                   *, num_classes, n_valid):
    n_pad = labels_ref.shape[1]

    lbl_row = labels_ref[...]                                  # (1, n_pad) int32

    # ---------------- vectorized membership test (VPU) ---------------------
    member = lbl_row == cls_ref[0]
    for j in range(1, num_classes):                            # tiny static class set
        member = jnp.logical_or(member, lbl_row == cls_ref[j])
    col = lax.broadcasted_iota(jnp.int32, (1, n_pad), 1)
    member = jnp.logical_and(member, col < n_valid)            # drop padded columns
    mask_f = member.astype(jnp.float32)                        # (1, n_pad)

    # number of selected rows (exact: sum of 0/1 floats)
    count_ref[...] = jnp.sum(mask_f, axis=1, keepdims=True).astype(jnp.int32)

    # ---------------- vectorized stable compaction (MXU + VPU) -------------
    # Inclusive prefix sum via MXU: csum[s] = sum_{t <= s} mask[t].
    r = lax.broadcasted_iota(jnp.int32, (n_pad, n_pad), 0)     # r[o, s] = o
    c = lax.broadcasted_iota(jnp.int32, (n_pad, n_pad), 1)     # c[o, s] = s
    upper = (r <= c).astype(jnp.float32)                       # (n_pad, n_pad)
    csum = jnp.dot(mask_f, upper, preferred_element_type=jnp.float32)
    pos = csum.astype(jnp.int32) - 1                           # dest row per source row

    # One-hot gather matrix: P[o, s] = member[s] & (pos[s] == o).
    p_bool = jnp.logical_and(pos == r, member)                 # (1,n) broadcasts to (n,n)
    p_gather = p_bool.astype(data_ref.dtype)

    # ---------------- gather (single MXU matmul + lane reduce) -------------
    out_data_ref[...] = jnp.dot(
        p_gather, data_ref[...],
        preferred_element_type=jnp.float32).astype(out_data_ref.dtype)
    # Labels gathered with the same one-hot rows (exact: <=1 nonzero per row,
    # labels << 2^24 so the f32 path is exact).
    out_labels_ref[...] = jnp.sum(
        p_bool.astype(jnp.float32) * lbl_row.astype(jnp.float32),
        axis=1, keepdims=True).astype(jnp.int32)


def _round_up(x, m):
    return (x + m - 1) // m * m


def subset_dataset_by_class(data, labels, class_labels):
    """Returns (padded_data, padded_labels, count): the first `count` rows are
    the samples whose label is in `class_labels`, in original order; rows
    >= count are zeros."""
    n, d = data.shape
    num_classes = int(class_labels.shape[0])
    assert num_classes >= 1, "class_labels must be non-empty"

    n_pad = _round_up(max(n, 8), 128)      # lane-dense one-hot / label vectors
    d_pad = _round_up(max(d, 128), 128)    # lane-dense output write-back

    data_p = jnp.pad(data, ((0, n_pad - n), (0, d_pad - d)))
    labels_row = jnp.pad(labels.astype(jnp.int32), (0, n_pad - n)).reshape(1, n_pad)
    cls = class_labels.astype(jnp.int32)

    itemsize = data.dtype.itemsize
    est_bytes = (2 * n_pad * d_pad * itemsize        # data + gathered data blocks
                 + 6 * n_pad * n_pad * 4             # iota / triangular / P / csum temps
                 + 8 * n_pad * 4 + (1 << 16))
    # TODO(synk): datasets too large for a single VMEM-resident block need a
    # row-chunked grid + run-coalesced HBM DMA gather; not needed at these sizes.
    assert est_bytes < (48 << 20), "dataset too large for single-block VMEM gather"

    kernel = functools.partial(_subset_kernel, num_classes=num_classes, n_valid=n)

    out_data, out_labels, count = pl.pallas_call(
        kernel,
        out_shape=(
            jax.ShapeDtypeStruct((n_pad, d_pad), data.dtype),   # gathered (padded) data
            jax.ShapeDtypeStruct((n_pad, 1), jnp.int32),        # gathered (padded) labels
            jax.ShapeDtypeStruct((1, 1), jnp.int32),            # count of selected rows
        ),
        in_specs=[
            pl.BlockSpec(memory_space=pltpu.MemorySpace.SMEM),  # class labels (scalars)
            pl.BlockSpec(memory_space=pltpu.MemorySpace.VMEM),  # ground-truth labels row
            pl.BlockSpec(memory_space=pltpu.MemorySpace.VMEM),  # feature matrix
        ],
        out_specs=(
            pl.BlockSpec(memory_space=pltpu.MemorySpace.VMEM),
            pl.BlockSpec(memory_space=pltpu.MemorySpace.VMEM),
            pl.BlockSpec(memory_space=pltpu.MemorySpace.VMEM),
        ),
        compiler_params=pltpu.CompilerParams(
            vmem_limit_bytes=int(min(max(2 * est_bytes, 8 << 20), 64 << 20))),
    )(cls, labels_row, data_p)

    return out_data[:n, :d], out_labels[:n, 0], count[0, 0]


def subset_datasets_by_class(datasets, class_labels):
    """datasets: dict name -> (data, labels).  Mirrors nn.Module.forward."""
    # TODO(synk): dataset-object plumbing (`.subset()`, Counter bookkeeping) has
    # no array equivalent; the dict of padded arrays + counts stands in for it.
    out = {}
    for name, (data, labels) in datasets.items():
        out[name] = subset_dataset_by_class(data, labels, class_labels)
    return out


# ---------------------------------------------------------------------------
if __name__ == "__main__":
    key = jax.random.PRNGKey(0)
    num_total_classes = 8
    class_labels = jnp.array([1, 3, 5], dtype=jnp.int32)   # the "kept" classes

    # Two small synthetic datasets (dict of (features, ground_truth)).
    shapes = {"train": (128, 256), "val": (64, 256)}
    datasets = {}
    for name, (n, d) in shapes.items():
        key, k1, k2 = jax.random.split(key, 3)
        data = jax.random.normal(k1, (n, d), dtype=jnp.float32)
        labels = jax.random.randint(k2, (n,), 0, num_total_classes, dtype=jnp.int32)
        datasets[name] = (data, labels)

    result = subset_datasets_by_class(datasets, class_labels)
    jax.block_until_ready(result)

    # Reference check against the PyTorch module's pure-Python semantics.
    class_set = set(np.asarray(class_labels).tolist())
    ok = True
    for name, (data, labels) in datasets.items():
        labels_np = np.asarray(labels)
        data_np = np.asarray(data)
        ref_idx = [i for i, lbl in enumerate(labels_np.tolist()) if lbl in class_set]
        sub_data, sub_labels, count = result[name]
        count = int(count)
        ok &= count == len(ref_idx)
        ok &= np.array_equal(np.asarray(sub_labels)[:count], labels_np[ref_idx])
        ok &= np.allclose(np.asarray(sub_data)[:count], data_np[ref_idx])
    assert ok, "Pallas subset result does not match reference"

    print("KERNEL_OK")
</pallas_src>

<mosaic_0001>
module attributes {stable_mosaic.version = 11 : i64} {
  func.func @_subset_kernel(%arg0: memref<3xi32, #tpu.memory_space<smem>>, %arg1: memref<1x128xi32, #tpu.memory_space<vmem>>, %arg2: memref<128x256xf32, #tpu.memory_space<vmem>>, %arg3: memref<128x256xf32, #tpu.memory_space<vmem>>, %arg4: memref<128x1xi32, #tpu.memory_space<vmem>>, %arg5: memref<1x1xi32, #tpu.memory_space<vmem>>) attributes {dimension_semantics = [], scalar_prefetch = 0 : i64, scratch_operands = 0 : i64, tpu.core_type = #tpu.core_type<tc>} {
    %c0 = arith.constant 0 : index
    %c0_0 = arith.constant 0 : index
    %0 = vector.load %arg1[%c0, %c0_0] : memref<1x128xi32, #tpu.memory_space<vmem>>, vector<1x128xi32>
    %c0_1 = arith.constant 0 : index
    %1 = memref.load %arg0[%c0_1] : memref<3xi32, #tpu.memory_space<smem>>
    %2 = vector.broadcast %1 : i32 to vector<1x128xi32>
    %3 = arith.cmpi eq, %0, %2 : vector<1x128xi32>
    %c1 = arith.constant 1 : index
    %4 = memref.load %arg0[%c1] : memref<3xi32, #tpu.memory_space<smem>>
    %5 = vector.broadcast %4 : i32 to vector<1x128xi32>
    %6 = arith.cmpi eq, %0, %5 : vector<1x128xi32>
    %7 = arith.ori %3, %6 : vector<1x128xi1>
    %c2 = arith.constant 2 : index
    %8 = memref.load %arg0[%c2] : memref<3xi32, #tpu.memory_space<smem>>
    %9 = vector.broadcast %8 : i32 to vector<1x128xi32>
    %10 = arith.cmpi eq, %0, %9 : vector<1x128xi32>
    %11 = arith.ori %7, %10 : vector<1x128xi1>
    %12 = tpu.iota {dimensions = array<i32: 1>} : vector<1x128xi32>
    %c128_i32 = arith.constant 128 : i32
    %13 = vector.broadcast %c128_i32 : i32 to vector<1x128xi32>
    %14 = arith.cmpi slt, %12, %13 : vector<1x128xi32>
    %15 = arith.andi %11, %14 : vector<1x128xi1>
    %16 = arith.extui %15 : vector<1x128xi1> to vector<1x128xi32>
    %17 = arith.sitofp %16 : vector<1x128xi32> to vector<1x128xf32>
    %cst = arith.constant dense<0.000000e+00> : vector<1xf32>
    %18 = vector.multi_reduction <add>, %17, %cst [1] : vector<1x128xf32> to vector<1xf32>
    %19 = vector.shape_cast %18 : vector<1xf32> to vector<1x1xf32>
    %20 = arith.fptosi %19 : vector<1x1xf32> to vector<1x1xi32>
    %c0_2 = arith.constant 0 : index
    %c0_3 = arith.constant 0 : index
    %21 = vector.load %arg5[%c0_2, %c0_3] : memref<1x1xi32, #tpu.memory_space<vmem>>, vector<1x1xi32>
    tpu.vector_store %arg5[%c0_2, %c0_3], %20 {strides = array<i32>} : memref<1x1xi32, #tpu.memory_space<vmem>>, vector<1x1xi32>,
    %22 = tpu.iota {dimensions = array<i32: 0>} : vector<128x128xi32>
    %23 = tpu.iota {dimensions = array<i32: 1>} : vector<128x128xi32>
    %24 = arith.cmpi sle, %22, %23 : vector<128x128xi32>
    %25 = arith.extui %24 : vector<128x128xi1> to vector<128x128xi32>
    %26 = arith.sitofp %25 : vector<128x128xi32> to vector<128x128xf32>
    %cst_4 = arith.constant dense<0.000000e+00> : vector<1x128xf32>
    %27 = tpu.matmul %17, %26, %cst_4 {dimension_numbers = #tpu.dot_dimension_numbers<[1], [0], [0], [1], [0, 0, 1, 1], [], []>} : vector<1x128xf32>, vector<128x128xf32>, vector<1x128xf32> -> vector<1x128xf32>
    %28 = arith.fptosi %27 : vector<1x128xf32> to vector<1x128xi32>
    %c1_i32 = arith.constant 1 : i32
    %29 = vector.broadcast %c1_i32 : i32 to vector<1x128xi32>
    %30 = arith.subi %28, %29 : vector<1x128xi32>
    %31 = vector.broadcast %30 : vector<1x128xi32> to vector<128x128xi32>
    %32 = arith.cmpi eq, %31, %22 : vector<128x128xi32>
    %33 = vector.broadcast %15 : vector<1x128xi1> to vector<128x128xi1>
    %34 = arith.andi %32, %33 : vector<128x128xi1>
    %35 = arith.extui %34 : vector<128x128xi1> to vector<128x128xi32>
    %36 = arith.sitofp %35 : vector<128x128xi32> to vector<128x128xf32>
    %c0_5 = arith.constant 0 : index
    %c0_6 = arith.constant 0 : index
    %37 = vector.load %arg2[%c0_5, %c0_6] : memref<128x256xf32, #tpu.memory_space<vmem>>, vector<128x256xf32>
    %cst_7 = arith.constant dense<0.000000e+00> : vector<128x256xf32>
    %38 = tpu.matmul %36, %37, %cst_7 {dimension_numbers = #tpu.dot_dimension_numbers<[1], [0], [0], [1], [0, 0, 1, 1], [], []>} : vector<128x128xf32>, vector<128x256xf32>, vector<128x256xf32> -> vector<128x256xf32>
    %c0_8 = arith.constant 0 : index
    %c0_9 = arith.constant 0 : index
    %39 = vector.load %arg3[%c0_8, %c0_9] : memref<128x256xf32, #tpu.memory_space<vmem>>, vector<128x256xf32>
    tpu.vector_store %arg3[%c0_8, %c0_9], %38 {strides = array<i32>} : memref<128x256xf32, #tpu.memory_space<vmem>>, vector<128x256xf32>,
    %40 = arith.extui %34 : vector<128x128xi1> to vector<128x128xi32>
    %41 = arith.sitofp %40 : vector<128x128xi32> to vector<128x128xf32>
    %42 = arith.sitofp %0 : vector<1x128xi32> to vector<1x128xf32>
    %43 = vector.broadcast %42 : vector<1x128xf32> to vector<128x128xf32>
    %44 = arith.mulf %41, %43 : vector<128x128xf32>
    %cst_10 = arith.constant dense<0.000000e+00> : vector<128xf32>
    %45 = vector.multi_reduction <add>, %44, %cst_10 [1] : vector<128x128xf32> to vector<128xf32>
    %46 = vector.shape_cast %45 : vector<128xf32> to vector<128x1xf32>
    %47 = arith.fptosi %46 : vector<128x1xf32> to vector<128x1xi32>
    %c0_11 = arith.constant 0 : index
    %c0_12 = arith.constant 0 : index
    %48 = vector.load %arg4[%c0_11, %c0_12] : memref<128x1xi32, #tpu.memory_space<vmem>>, vector<128x1xi32>
    tpu.vector_store %arg4[%c0_11, %c0_12], %47 {strides = array<i32>} : memref<128x1xi32, #tpu.memory_space<vmem>>, vector<128x1xi32>,
    return
  }
}

</mosaic_0001>

<bundles_post_ra>
// kernel: tpu_custom_call.1
= control target key start
LH: loop header
LB: loop body
LE: loop exit
PB: predicated region body
PF: predicated region fallthrough
CT: control target
= control target key end

     0   :  { %11 = vsyncpa [#allocation5], 0  ;;  %s1518_s0 = inlined_call_operand.hbm [shape: s32[3], index: 0, kind: input, shape index: {}]   ;;  %s1519_s1 = inlined_call_operand.vmem [shape: s32[1,128], index: 1, kind: input, shape index: {}]   ;;  %s1520_s2 = inlined_call_operand.hbm [shape: f32[128,256], index: 2, kind: input, shape index: {}]   ;;  %s1521_s3 = inlined_call_operand.hbm [shape: f32[128,256], index: 3, kind: output, shape index: {0}]   ;;  %s1522_s4 = inlined_call_operand.vmem [shape: s32[128,1], index: 4, kind: output, shape index: {1}]   ;;  %s1523_s5 = inlined_call_operand.hbm [shape: s32[1,1], index: 5, kind: output, shape index: {2}]  }
   0x1   :  { %12 = vsyncpa [#allocation3], 0 }
   0x2   :  { %13 = vsyncpa [#allocation4], 0 }
   0x3   :  { %14 = vsyncpa [#allocation9], 0  ;;  %s869_s20 = scalar_lea.hbm %s1518_s0, 16 }
   0x4   :  { %p870_p0 = scmp.ne.s32.totalorder %s1518_s0, %s869_s20  ;;  %p873_p1 = scmp.lt.u32.totalorder %s869_s20, %s1518_s0 }
   0x6   :  { %p875_p2 = pnand %p873_p1, %p870_p0 }
   0x8   :  { %878 = shalt.err (!%p875_p2)
}
   0x9   :  { %s953_s25 = smov [#allocation2]   ;;  %s954_s28 = smov [#allocation6]  }
   0xa   :  { %22 = dma.hbm_to_smem %s1518_s0, 16, %s953_s25, [#allocation5]  }
   0xb   :  { %s30_s29 = sshll.u32 %s954_s28, 4  ;;  %s879_s7 = scalar_lea.hbm %s1520_s2, 4096  ;;  %s31_s29 = int_to_ptr.vmem [resolvable:$true] %s30_s29 }
   0xc   :  { %p880_p3 = scmp.ne.s32.totalorder %s1520_s2, %s879_s7  ;;  %p883_p4 = scmp.lt.u32.totalorder %s879_s7, %s1520_s2 }
   0xe   :  { %p885_p5 = pnand %p883_p4, %p880_p3 }
  0x10   :  { %888 = shalt.err (!%p885_p5)
}
  0x11   :  { %s889_s12 = scalar_lea.vmem %s31_s29, 4096  ;;  %p894_p7 = scmp.lt.s32.totalorder %s31_s29, %s31_s29 }
  0x12   :  { %p890_p6 = scmp.ne.s32.totalorder %s31_s29, %s889_s12  ;;  %p895_p8 = scmp.lt.s32.totalorder %s889_s12, %s889_s12 }
  0x14   :  { %p896_p9 = por %p895_p8, %p894_p7 }
  0x16   :  { %p897_p10 = pnand %p896_p9, %p890_p6 }
  0x18   :  { %900 = shalt.err (!%p897_p10)
}
  0x19   :  { %s955_s0 = smov 256   ;;  %s956_s13 = smov 16  }
  0x1a   :  { %36 = dma.hbm_to_vmem [thread:$0]  %s1520_s2, 4096, %s31_s29, [#allocation3], %s955_s0, %s955_s0, %s956_s13  }
  0x1b   :  { %945 = dma.done.wait [#allocation5], 16  }
  0x1c   :  { %946 = vsyncadd [#allocation5], 4294967280 }
  0x1d   :  { %947 = dma.done.wait [#allocation3], 4096  }
  0x1e   :  { %948 = vsyncadd [#allocation3], 4294963200 }
  0x1f   :  { %43 = sfence }
  0x20   :  { %v56_v0 = vlaneseq  ;;  %v957_v1 = vmov 0.0|0.0   ;;  %v958_v2 = vmov 0.0   ;;  %vm959_vm0 = vmmov 0   ;;  %v280_v11 = vld [vmem:[#allocation6 + $0x8] sm:$0xff]  ;;  %v282_v14 = vld [vmem:[#allocation6 + $0x18] sm:$0xff]  ;;  %v279_v15 = vld [vmem:[#allocation6] sm:$0xff] }
  0x21   :  { %749 = vmatprep.subr.bf16.mxu0 %v957_v1  ;;  %399 = vmatprep.mubr.f32.mxu1 %v958_v2  ;;  %v960_v10 = vmov 1.0|1.0   ;;  %v281_v16 = vld [vmem:[#allocation6 + $0x10] sm:$0xff]  ;;  %v284_v17 = vld [vmem:[#allocation6 + $0x28] sm:$0xff]  ;;  %v286_v18 = vld [vmem:[#allocation6 + $0x38] sm:$0xff]  ;;  %v1069_v20 = vpack.c.bf16 %v282_v14, %v280_v11  ;;  %s1101_s2 = sld [smem:[#allocation2]] }
  0x22   :  { %v1024_v3 = vand.u32 127, %v56_v0  ;;  %v1026_v4 = vshrl.u32 %v56_v0, 7  ;;  %746 = vmatprep.mubr.msk.f32.mxu0 %vm959_vm0, %v958_v2  ;;  %v1071_v21 = vpack.c.bf16 %v281_v16, %v279_v15  ;;  %v283_v22 = vld [vmem:[#allocation6 + $0x20] sm:$0xff]  ;;  %v285_v23 = vld [vmem:[#allocation6 + $0x30] sm:$0xff]  ;;  %v1080_v25 = vpack.c.bf16 %v286_v18, %v284_v17  ;;  %v288_v26 = vld [vmem:[#allocation6 + $0x48] sm:$0xff]  ;;  %s1103_s16 = sld [smem:[#allocation2 + $0x1]] }
  0x23   :  { %v290_v27 = vld [vmem:[#allocation6 + $0x58] sm:$0xff]  ;;  %805 = vmatprep.subr.bf16.mxu1 %v1069_v20  ;;  %v1085_v28 = vpack.c.bf16 %v285_v23, %v283_v22  ;;  %v287_v30 = vld [vmem:[#allocation6 + $0x40] sm:$0xff]  ;;  %v289_v31 = vld [vmem:[#allocation6 + $0x50] sm:$0xff]  ;;  %s1119_s17 = sld [smem:[#allocation2 + $0x2]]  ;;  %v961_v59 = vmov 1.0  }
  0x24   :  { %v1030_v5 = vadd.s32 8, %v1026_v4  ;;  %vm86_vm1 = vcmp.le.s32.totalorder %v1026_v4, %v1024_v3  ;;  %v1035_v6 = vadd.s32 16, %v1026_v4  ;;  %v1038_v7 = vadd.s32 24, %v1026_v4  ;;  %813 = vmatpush1.bf16.msra.mxu1 %v1071_v21  ;;  %v292_v34 = vld [vmem:[#allocation6 + $0x68] sm:$0xff]  ;;  %v294_v35 = vld [vmem:[#allocation6 + $0x78] sm:$0xff]  ;;  %v291_v38 = vld [vmem:[#allocation6 + $0x60] sm:$0xff] }
  0x25   :  { %v1041_v8 = vadd.s32 32, %v1026_v4  ;;  %v1050_v9 = vadd.s32 40, %v1026_v4  ;;  %v1059_v12 = vadd.s32 48, %v1026_v4  ;;  %v1062_v13 = vadd.s32 56, %v1026_v4  ;;  %806 = vmatprep.subr.bf16.mxu1 %v1080_v25  ;;  %v293_v39 = vld [vmem:[#allocation6 + $0x70] sm:$0xff]  ;;  %v296_v42 = vld [vmem:[#allocation6 + $0x88] sm:$0xff] }
  0x26   :  { %vm87_vm2 = vcmp.le.s32.totalorder %v1030_v5, %v1024_v3  ;;  %vm88_vm3 = vcmp.le.s32.totalorder %v1035_v6, %v1024_v3  ;;  %vm89_vm4 = vcmp.le.s32.totalorder %v1038_v7, %v1024_v3  ;;  %v1067_v19 = vadd.s32 64, %v1026_v4  ;;  %v298_v43 = vld [vmem:[#allocation6 + $0x98] sm:$0xff]  ;;  %v295_v48 = vld [vmem:[#allocation6 + $0x80] sm:$0xff]  ;;  %v297_v49 = vld [vmem:[#allocation6 + $0x90] sm:$0xff] }
  0x27   :  { %vm750_vm5 = vmpackc.low %vm87_vm2, %vm86_vm1  ;;  %vm90_vm7 = vcmp.le.s32.totalorder %v1041_v8, %v1024_v3  ;;  %vm91_vm8 = vcmp.le.s32.totalorder %v1050_v9, %v1024_v3  ;;  %vm92_vm10 = vcmp.le.s32.totalorder %v1059_v12, %v1024_v3  ;;  %vm93_vm11 = vcmp.le.s32.totalorder %v1062_v13, %v1024_v3  ;;  %v300_v50 = vld [vmem:[#allocation6 + $0xa8] sm:$0xff]  ;;  %v302_v51 = vld [vmem:[#allocation6 + $0xb8] sm:$0xff] }
  0x28   :  { %751 = vmatpush3.bf16.msk.msra.mxu0 %vm750_vm5, %v960_v10  ;;  %vm753_vm6 = vmpackc.low %vm89_vm4, %vm88_vm3  ;;  %v1078_v24 = vadd.s32 72, %v1026_v4  ;;  %v1089_v29 = vpack.c.bf16 %v290_v27, %v288_v26  ;;  %vm94_vm13 = vcmp.le.s32.totalorder %v1067_v19, %v1024_v3  ;;  %v1096_v32 = vadd.s32 80, %v1026_v4  ;;  %814 = vmatpush1.bf16.msra.mxu1 %v1085_v28  ;;  %v1136_v52 = vld [vmem:[%s1519_s1] sm:$0x1]  ;;  %v301_v61 = vld [vmem:[#allocation6 + $0xb0] sm:$0xff]  ;;  %s963_s1 = smov [#allocation8]  }
  0x29   :  { %752 = vmatprep.subr.bf16.mxu0 %v957_v1  ;;  %vm756_vm9 = vmpackc.low %vm91_vm8, %vm90_vm7  ;;  %v1099_v33 = vadd.s32 88, %v1026_v4  ;;  %v783_v36 = vpack.c.bf16 %v289_v31, %v287_v30  ;;  %v785_v37 = vpack.c.bf16 %v294_v35, %v292_v34  ;;  %v1114_v40 = vadd.s32 96, %v1026_v4  ;;  %v299_v60 = vld [vmem:[#allocation6 + $0xa0] sm:$0xff]  ;;  %v304_v63 = vld [vmem:[#allocation6 + $0xc8] sm:$0xff]  ;;  %s612_s20 = sshll.u32 %s963_s1, 4  ;;  %s613_s20 = int_to_ptr.vmem [resolvable:$true] %s612_s20 }
  0x2a   :  { %vm759_vm12 = vmpackc.low %vm93_vm11, %vm92_vm10  ;;  %vm95_vm14 = vcmp.le.s32.totalorder %v1078_v24, %v1024_v3  ;;  %807 = vmatprep.subr.bf16.mxu1 %v1089_v29  ;;  %vm96_vm0 = vcmp.le.s32.totalorder %v1096_v32, %v1024_v3  ;;  %v1117_v41 = vadd.s32 104, %v1026_v4  ;;  %v787_v44 = vpack.c.bf16 %v293_v39, %v291_v38  ;;  %v306_v0 = vld [vmem:[#allocation6 + $0xd8] sm:$0xff]  ;;  %v308_v14 = vld [vmem:[#allocation6 + $0xe8] sm:$0xff]  ;;  %s901_s21 = scalar_lea.vmem %s613_s20, 16  ;;  %s905_s22 = scalar_lea.vmem %s613_s20, 32 }
  0x2b   :  { %vm762_vm15 = vmpackc.low %vm95_vm14, %vm94_vm13  ;;  %vm97_vm1 = vcmp.le.s32.totalorder %v1099_v33, %v1024_v3  ;;  %v1124_v45 = vadd.s32 112, %v1026_v4  ;;  %v1127_v46 = vadd.s32 120, %v1026_v4  ;;  %v789_v47 = vpack.c.bf16 %v298_v43, %v296_v42  ;;  %v310_v15 = vld [vmem:[#allocation6 + $0xf8] sm:$0xff]  ;;  %v307_v17 = vld [vmem:[#allocation6 + $0xe0] sm:$0xff]  ;;  %p902_p11 = scmp.ne.s32.totalorder %s613_s20, %s901_s21  ;;  %p906_p12 = scmp.lt.s32.totalorder %s613_s20, %s613_s20 }
  0x2c   :  { %754 = vmatpush3.bf16.msk.msra.mxu0 %vm753_vm6, %v960_v10  ;;  %815 = vmatpush1.bf16.msra.mxu1 %v783_v36  ;;  %vm765_vm2 = vmpackc.low %vm97_vm1, %vm96_vm0  ;;  %vm98_vm3 = vcmp.le.s32.totalorder %v1114_v40, %v1024_v3  ;;  %vm99_vm4 = vcmp.le.s32.totalorder %v1117_v41, %v1024_v3  ;;  %v46_v53 = vstv %s1101_s2  ;;  %v49_v54 = vstv %s1103_s16  ;;  %v309_v18 = vld [vmem:[#allocation6 + $0xf0] sm:$0xff]  ;;  %p907_p13 = scmp.lt.s32.totalorder %s905_s22, %s901_s21 }
  0x2d   :  { %755 = vmatprep.subr.bf16.mxu0 %v957_v1  ;;  %808 = vmatprep.subr.bf16.mxu1 %v785_v37  ;;  %v791_v55 = vpack.c.bf16 %v297_v49, %v295_v48  ;;  %vm768_vm5 = vmpackc.low %vm99_vm4, %vm98_vm3  ;;  %vm100_vm6 = vcmp.le.s32.totalorder %v1124_v45, %v1024_v3  ;;  %vm101_vm7 = vcmp.le.s32.totalorder %v1127_v46, %v1024_v3  ;;  %v53_v57 = vstv %s1119_s17  ;;  %v303_v3 = vld [vmem:[#allocation6 + $0xc0] sm:$0xff] }
  0x2e   :  { %v793_v56 = vpack.c.bf16 %v302_v51, %v300_v50  ;;  %vm47_vm8 = vcmp.eq.s32.totalorder %v1136_v52, %v46_v53  ;;  %vm771_vm10 = vmpackc.low %vm101_vm7, %vm100_vm6  ;;  %v795_v62 = vpack.c.bf16 %v301_v61, %v299_v60  ;;  %v801_v16 = vpack.c.bf16 %v310_v15, %v308_v14  ;;  %p908_p0 = por %p907_p13, %p906_p12 }
  0x2f   :  { %vm62_vm14 = vcmask 1040384   ;;  %v208_v23 = vsub.s32 0, %v1026_v4  ;;  %v504_v34 = vcvt.s32.f32 %v1136_v52 }
  0x30   :  { %757 = vmatpush3.bf16.msk.msra.mxu0 %vm756_vm9, %v960_v10  ;;  %816 = vmatpush1.bf16.msra.mxu1 %v787_v44  ;;  %vm50_vm9 = vcmp.eq.s32.totalorder %v1136_v52, %v49_v54  ;;  %p909_p1 = pnand %p908_p0, %p902_p11 }
  0x31   :  { %758 = vmatprep.subr.bf16.mxu0 %v957_v1  ;;  %809 = vmatprep.subr.bf16.mxu1 %v789_v47  ;;  %vm51_vm11 = vmor %vm47_vm8, %vm50_vm9  ;;  %v1179_v38 = vrot.slane %v504_v34, %v208_v23 }
  0x34   :  { %760 = vmatpush3.bf16.msk.msra.mxu0 %vm759_vm12, %v960_v10  ;;  %817 = vmatpush1.bf16.msra.mxu1 %v791_v55  ;;  %vm54_vm12 = vcmp.eq.s32.totalorder %v1136_v52, %v53_v57 }
  0x35   :  { %761 = vmatprep.subr.bf16.mxu0 %v957_v1  ;;  %810 = vmatprep.subr.bf16.mxu1 %v793_v56  ;;  %vm1153_vm13 = vmor %vm51_vm11, %vm54_vm12 }
  0x38   :  { %763 = vmatpush3.bf16.msk.msra.mxu0 %vm762_vm15, %v960_v10  ;;  %818 = vmatpush1.bf16.msra.mxu1 %v795_v62 }
  0x39   :  { %764 = vmatprep.subr.bf16.mxu0 %v957_v1 }
  0x3c   :  { %766 = vmatpush3.bf16.msk.msra.mxu0 %vm765_vm2, %v960_v10 }
  0x3d   :  { %767 = vmatprep.subr.bf16.mxu0 %v957_v1 }
  0x40   :  { %769 = vmatpush3.bf16.msk.msra.mxu0 %vm768_vm5, %v960_v10 }
  0x41   :  { %770 = vmatprep.subr.bf16.mxu0 %v957_v1  ;;  %v797_v1 = vpack.c.bf16 %v306_v0, %v304_v63 }
  0x43   :  { %811 = vmatprep.subr.bf16.mxu1 %v797_v1 }
  0x44   :  { %772 = vmatpush3.bf16.msk.msra.mxu0 %vm771_vm10, %v960_v10  ;;  %v305_v10 = vld [vmem:[#allocation6 + $0xd0] sm:$0xff] }
  0x45   :  { %774 = vmatprep.subr.bf16.mxu0 %v1069_v20  ;;  %v799_v11 = vpack.c.bf16 %v305_v10, %v303_v3  ;;  %v803_v20 = vpack.c.bf16 %v309_v18, %v307_v17 }
  0x47   :  { %747 = vmatmul.mubr.msk.f32.vlgmr.msra.gmra.mrb[0].mxu0 %vm1153_vm13, %v961_v59  ;;  %819 = vmatpush1.bf16.msra.mxu1 %v799_v11 }
  0x48   :  { %776 = vmatpush1.bf16.msra.mxu0 %v1071_v21  ;;  %375 = vmatprep.mubr.f32.mxu0 %v958_v2  ;;  %v630_v21 = vsel %vm1153_vm13, 1.0, %v958_v2 }
  0x49   :  { %778 = vmatprep.subr.bf16.mxu0 %v1080_v25  ;;  %812 = vmatprep.subr.bf16.mxu1 %v801_v16  ;;  %v63_v22 = vsel %vm62_vm14, %v630_v21, 0.0  ;;  %v962_v25 = vmov 0  }
  0x4a   :  { %64 = vadd.xlane.f32.xlu0 %v63_v22  ;;  %v60_v26 = vsel %vm1153_vm13, 1, %v962_v25 }
  0x4b   :  { %820 = vmatpush1.bf16.msra.mxu1 %v803_v20  ;;  %v229_v30 = vrot.slane %v60_v26, %v208_v23 }
  0x4c   :  { %780 = vmatpush1.bf16.msra.mxu0 %v1085_v28 }
  0x4d   :  { %782 = vmatprep.subr.bf16.mxu0 %v1089_v29  ;;  %vm1173_vm15 = vcmp.eq.s32.totalorder %v229_v30, 1 }
  0x50   :  { %784 = vmatpush1.bf16.msra.mxu0 %v783_v36 }
  0x51   :  { %786 = vmatprep.subr.bf16.mxu0 %v785_v37 }
  0x54   :  { %788 = vmatpush1.bf16.msra.mxu0 %v787_v44 }
  0x55   :  { %790 = vmatprep.subr.bf16.mxu0 %v789_v47 }
  0x58   :  { %792 = vmatpush1.bf16.msra.mxu0 %v791_v55 }
  0x59   :  { %794 = vmatprep.subr.bf16.mxu0 %v793_v56 }
  0x5c   :  { %796 = vmatpush1.bf16.msra.mxu0 %v795_v62 }
  0x5d   :  { %798 = vmatprep.subr.bf16.mxu0 %v797_v1 }
  0x60   :  { %800 = vmatpush1.bf16.msra.mxu0 %v799_v11 }
  0x61   :  { %802 = vmatprep.subr.bf16.mxu0 %v801_v16 }
  0x64   :  { %804 = vmatpush1.bf16.msra.mxu0 %v803_v20 }
  0xd7   :  { %v65_v17 = vpop.xlane.xlu0 %64 }
  0xd8   :  { %v821_v18 = vtrunc.f32 %v65_v17 }
  0xda   :  { %v822_v20 = vcvt.f32.s32 %v821_v18 }
 0x11a   :  { %v200_v27 = vpop.f32.mrb[0].mxu0 }
 0x11b   :  { %v823_v28 = vtrunc.f32 %v200_v27  ;;  %v748_v29 = vpop.f32.mrb[1].mxu0 }
 0x11d   :  { %v824_v31 = vcvt.f32.s32 %v823_v28 }
 0x11f   :  { %v664_v35 = vadd.s32 4294967295, %v824_v31 }
 0x121   :  { %v1177_v37 = vrot.slane %v664_v35, %v208_v23 }
 0x123   :  { %vm210_vm0 = vcmp.eq.s32.totalorder %v1177_v37, %v1026_v4  ;;  %vm214_vm1 = vcmp.eq.s32.totalorder %v1177_v37, %v1041_v8  ;;  %vm211_vm2 = vcmp.eq.s32.totalorder %v1177_v37, %v1030_v5  ;;  %vm215_vm4 = vcmp.eq.s32.totalorder %v1177_v37, %v1050_v9 }
 0x124   :  { %vm231_vm3 = vmand %vm210_vm0, %vm1173_vm15  ;;  %vm212_vm6 = vcmp.eq.s32.totalorder %v1177_v37, %v1035_v6  ;;  %vm213_vm8 = vcmp.eq.s32.totalorder %v1177_v37, %v1038_v7  ;;  %vm216_vm10 = vcmp.eq.s32.totalorder %v1177_v37, %v1059_v12  ;;  %vm217_vm12 = vcmp.eq.s32.totalorder %v1177_v37, %v1062_v13 }
 0x125   :  { %681 = vmatmul.mubr.msk.f32.vlgmr.msra.gmra.mrb[2].mxu0 %vm231_vm3, %v961_v59  ;;  %vm235_vm5 = vmand %vm214_vm1, %vm1173_vm15  ;;  %v665_v39 = vsel %vm231_vm3, 1.0, %v958_v2  ;;  %vm218_vm14 = vcmp.eq.s32.totalorder %v1177_v37, %v1067_v19  ;;  %vm219_vm1 = vcmp.eq.s32.totalorder %v1177_v37, %v1078_v24  ;;  %vm220_vm3 = vcmp.eq.s32.totalorder %v1177_v37, %v1096_v32 }
 0x126   :  { %685 = vmatmul.mubr.msk.f32.vlgmr.msra.gmra.mrb[0].mxu1 %vm235_vm5, %v961_v59  ;;  %vm232_vm7 = vmand %vm211_vm2, %vm1173_vm15  ;;  %381 = vmatprep.mubr.f32.mxu0 %v958_v2  ;;  %v511_v4 = vmul.f32 %v665_v39, %v1179_v38  ;;  %v669_v5 = vsel %vm235_vm5, 1.0, %v958_v2  ;;  %vm221_vm5 = vcmp.eq.s32.totalorder %v1177_v37, %v1099_v33 }
 0x127   :  { %405 = vmatprep.mubr.f32.mxu1 %v958_v2  ;;  %v666_v8 = vsel %vm232_vm7, 1.0, %v958_v2  ;;  %vm236_vm9 = vmand %vm215_vm4, %vm1173_vm15  ;;  %v515_v6 = vmul.f32 %v669_v5, %v1179_v38 }
 0x128   :  { %v512_v9 = vmul.f32 %v666_v8, %v1179_v38  ;;  %527 = vadd.xlane.f32.xlu0 %v511_v4  ;;  %vm1215_vm11 = vmand %vm212_vm6, %vm1173_vm15  ;;  %v670_v42 = vsel %vm236_vm9, 1.0, %v958_v2 }
 0x129   :  { %682 = vmatmul.mubr.msk.f32.gmra.mrb[4].mxu0 %vm232_vm7, %v961_v59  ;;  %v667_v43 = vsel %vm1215_vm11, 1.0, %v958_v2  ;;  %vm1228_vm13 = vmand %vm213_vm8, %vm1173_vm15  ;;  %v516_v47 = vmul.f32 %v670_v42, %v1179_v38  ;;  %vm222_vm7 = vcmp.eq.s32.totalorder %v1177_v37, %v1114_v40 }
 0x12a   :  { %529 = vadd.xlane.f32.xlu1 %v512_v9  ;;  %686 = vmatmul.mubr.msk.f32.gmra.mrb[2].mxu1 %vm236_vm9, %v961_v59  ;;  %v513_v48 = vmul.f32 %v667_v43, %v1179_v38  ;;  %v668_v49 = vsel %vm1228_vm13, 1.0, %v958_v2  ;;  %vm1245_vm0 = vmand %vm216_vm10, %vm1173_vm15  ;;  %vm223_vm9 = vcmp.eq.s32.totalorder %v1177_v37, %v1117_v41 }
 0x12b   :  { %411 = vmatprep.mubr.f32.mxu1 %v958_v2  ;;  %387 = vmatprep.mubr.f32.mxu0 %v958_v2  ;;  %v514_v51 = vmul.f32 %v668_v49, %v1179_v38  ;;  %vm1259_vm2 = vmand %vm217_vm12, %vm1173_vm15  ;;  %v671_v52 = vsel %vm1245_vm0, 1.0, %v958_v2 }
 0x12c   :  { %v517_v53 = vmul.f32 %v671_v52, %v1179_v38  ;;  %v672_v54 = vsel %vm1259_vm2, 1.0, %v958_v2  ;;  %vm1277_vm4 = vmand %vm218_vm14, %vm1173_vm15  ;;  %vm225_vm14 = vcmp.eq.s32.totalorder %v1177_v37, %v1127_v46 }
 0x12d   :  { %533 = vadd.xlane.f32.xlu0 %v514_v51  ;;  %683 = vmatmul.mubr.msk.f32.gmra.mrb[6].mxu0 %vm1215_vm11, %v961_v59  ;;  %v518_v55 = vmul.f32 %v672_v54, %v1179_v38  ;;  %v673_v56 = vsel %vm1277_vm4, 1.0, %v958_v2  ;;  %vm1295_vm6 = vmand %vm219_vm1, %vm1173_vm15  ;;  %vm224_vm11 = vcmp.eq.s32.totalorder %v1177_v37, %v1124_v45 }
 0x12e   :  { %531 = vadd.xlane.f32.xlu1 %v513_v48  ;;  %687 = vmatmul.mubr.msk.f32.gmra.mrb[4].mxu1 %vm1245_vm0, %v961_v59  ;;  %v519_v57 = vmul.f32 %v673_v56, %v1179_v38  ;;  %v674_v58 = vsel %vm1295_vm6, 1.0, %v958_v2  ;;  %vm1313_vm8 = vmand %vm220_vm3, %vm1173_vm15 }
 0x12f   :  { %417 = vmatprep.mubr.f32.mxu1 %v958_v2  ;;  %393 = vmatprep.mubr.f32.mxu0 %v958_v2  ;;  %v520_v60 = vmul.f32 %v674_v58, %v1179_v38  ;;  %v675_v61 = vsel %vm1313_vm8, 1.0, %v958_v2  ;;  %vm1330_vm10 = vmand %vm221_vm5, %vm1173_vm15 }
 0x130   :  { %v521_v62 = vmul.f32 %v675_v61, %v1179_v38  ;;  %v676_v63 = vsel %vm1330_vm10, 1.0, %v958_v2  ;;  %vm1345_vm12 = vmand %vm222_vm7, %vm1173_vm15 }
 0x131   :  { %537 = vadd.xlane.f32.xlu0 %v516_v47  ;;  %684 = vmatmul.mubr.msk.f32.gmra.mrb[8].mxu0 %vm1228_vm13, %v961_v59  ;;  %v522_v45 = vmul.f32 %v676_v63, %v1179_v38  ;;  %v677_v0 = vsel %vm1345_vm12, 1.0, %v958_v2  ;;  %vm1363_vm0 = vmand %vm223_vm9, %vm1173_vm15 }
 0x132   :  { %535 = vadd.xlane.f32.xlu1 %v515_v6  ;;  %688 = vmatmul.mubr.msk.f32.gmra.mrb[6].mxu1 %vm1259_vm2, %v961_v59  ;;  %v523_v46 = vmul.f32 %v677_v0, %v1179_v38  ;;  %v678_v1 = vsel %vm1363_vm0, 1.0, %v958_v2  ;;  %vm1376_vm13 = vmand %vm224_vm11, %vm1173_vm15 }
 0x133   :  { %423 = vmatprep.mubr.f32.mxu1 %v958_v2  ;;  %v524_v41 = vmul.f32 %v678_v1, %v1179_v38  ;;  %v679_v10 = vsel %vm1376_vm13, 1.0, %v958_v2  ;;  %vm1387_vm1 = vmand %vm225_vm14, %vm1173_vm15  ;;  %vm67_vm15 = vcmask 0  }
 0x134   :  { %v525_v14 = vmul.f32 %v679_v10, %v1179_v38  ;;  %v680_v15 = vsel %vm1387_vm1, 1.0, %v958_v2  ;;  %68 = vst.msk [vmem:[#allocation8] sm:$0x1] %vm67_vm15, %v822_v20 }
 0x135   :  { %541 = vadd.xlane.f32.xlu0 %v518_v55  ;;  %v526_v16 = vmul.f32 %v680_v15, %v1179_v38 }
 0x136   :  { %539 = vadd.xlane.f32.xlu1 %v517_v53  ;;  %689 = vmatmul.mubr.msk.f32.gmra.mrb[8].mxu1 %vm1277_vm4, %v961_v59 }
 0x137   :  { %429 = vmatprep.mubr.f32.mxu1 %v958_v2 }
 0x139   :  { %545 = vadd.xlane.f32.xlu0 %v520_v60 }
 0x13a   :  { %543 = vadd.xlane.f32.xlu1 %v519_v57  ;;  %690 = vmatmul.mubr.msk.f32.gmra.mrb[10].mxu1 %vm1295_vm6, %v961_v59 }
 0x13b   :  { %435 = vmatprep.mubr.f32.mxu1 %v958_v2 }
 0x13d   :  { %549 = vadd.xlane.f32.xlu0 %v522_v45 }
 0x13e   :  { %547 = vadd.xlane.f32.xlu1 %v521_v62  ;;  %691 = vmatmul.mubr.msk.f32.gmra.mrb[12].mxu1 %vm1313_vm8, %v961_v59 }
 0x13f   :  { %441 = vmatprep.mubr.f32.mxu1 %v958_v2 }
 0x141   :  { %553 = vadd.xlane.f32.xlu0 %v524_v41 }
 0x142   :  { %551 = vadd.xlane.f32.xlu1 %v523_v46  ;;  %692 = vmatmul.mubr.msk.f32.gmra.mrb[14].mxu1 %vm1330_vm10, %v961_v59 }
 0x143   :  { %447 = vmatprep.mubr.f32.mxu1 %v958_v2 }
 0x145   :  { %557 = vadd.xlane.f32.xlu0 %v526_v16 }
 0x146   :  { %555 = vadd.xlane.f32.xlu1 %v525_v14  ;;  %693 = vmatmul.mubr.msk.f32.gmra.mrb[16].mxu1 %vm1345_vm12, %v961_v59 }
 0x147   :  { %453 = vmatprep.mubr.f32.mxu1 %v958_v2 }
 0x14a   :  { %694 = vmatmul.mubr.msk.f32.gmra.mrb[18].mxu1 %vm1363_vm0, %v961_v59 }
 0x14b   :  { %459 = vmatprep.mubr.f32.mxu1 %v958_v2 }
 0x14e   :  { %695 = vmatmul.mubr.msk.f32.gmra.mrb[20].mxu1 %vm1376_vm13, %v961_v59 }
 0x14f   :  { %465 = vmatprep.mubr.f32.mxu1 %v958_v2 }
 0x152   :  { %696 = vmatmul.mubr.msk.f32.gmra.mrb[22].mxu1 %vm1387_vm1, %v961_v59 }
 0x153   :  { %912 = shalt.err (!%p909_p1)
}
 0x154   :  { %s913_s25 = scalar_lea.hbm %s1523_s5, 16 }
 0x155   :  { %p914_p2 = scmp.ne.s32.totalorder %s1523_s5, %s913_s25  ;;  %p917_p3 = scmp.lt.u32.totalorder %s913_s25, %s1523_s5 }
 0x157   :  { %p919_p4 = pnand %p917_p3, %p914_p2 }
 0x159   :  { %922 = shalt.err (!%p919_p4)
}
 0x15a   :  { %615 = dma.vmem_to_hbm [thread:$0]  %s613_s20, 16, %s1523_s5, [#allocation9]   ;;  %vm575_vm2 = vcmask 7168  }
 0x1b5   :  { %v528_v2 = vpop.xlane.xlu0 %527 }
 0x1b6   :  { %v825_v59 = vtrunc.f32 %v528_v2 }
 0x1b7   :  { %v530_v21 = vpop.xlane.xlu1 %529 }
 0x1b8   :  { %v827_v22 = vtrunc.f32 %v530_v21  ;;  %v826_v23 = vcvt.f32.s32 %v825_v59 }
 0x1ba   :  { %v828_v25 = vcvt.f32.s32 %v827_v22  ;;  %576 = vst.msk [vmem:[%s1522_s4] sm:$0xff] %vm575_vm2, %v826_v23  ;;  %v534_v26 = vpop.xlane.xlu0 %533 }
 0x1bb   :  { %v532_v27 = vpop.xlane.xlu1 %531  ;;  %v831_v28 = vtrunc.f32 %v534_v26 }
 0x1bc   :  { %577 = vst.msk [vmem:[%s1522_s4 + $0x8] sm:$0xff] %vm575_vm2, %v828_v25  ;;  %v829_v29 = vtrunc.f32 %v532_v27 }
 0x1bd   :  { %v832_v30 = vcvt.f32.s32 %v831_v28 }
 0x1be   :  { %v830_v31 = vcvt.f32.s32 %v829_v29  ;;  %v538_v34 = vpop.xlane.xlu0 %537 }
 0x1bf   :  { %579 = vst.msk [vmem:[%s1522_s4 + $0x18] sm:$0xff] %vm575_vm2, %v832_v30  ;;  %v536_v35 = vpop.xlane.xlu1 %535  ;;  %v835_v36 = vtrunc.f32 %v538_v34 }
 0x1c0   :  { %578 = vst.msk [vmem:[%s1522_s4 + $0x10] sm:$0xff] %vm575_vm2, %v830_v31  ;;  %v833_v37 = vtrunc.f32 %v536_v35 }
 0x1c1   :  { %v836_v38 = vcvt.f32.s32 %v835_v36 }
 0x1c2   :  { %v834_v39 = vcvt.f32.s32 %v833_v37  ;;  %v542_v4 = vpop.xlane.xlu0 %541 }
 0x1c3   :  { %581 = vst.msk [vmem:[%s1522_s4 + $0x28] sm:$0xff] %vm575_vm2, %v836_v38  ;;  %v540_v5 = vpop.xlane.xlu1 %539  ;;  %v839_v8 = vtrunc.f32 %v542_v4 }
 0x1c4   :  { %580 = vst.msk [vmem:[%s1522_s4 + $0x20] sm:$0xff] %vm575_vm2, %v834_v39  ;;  %v837_v6 = vtrunc.f32 %v540_v5 }
 0x1c5   :  { %v840_v9 = vcvt.f32.s32 %v839_v8 }
 0x1c6   :  { %v838_v7 = vcvt.f32.s32 %v837_v6  ;;  %v546_v42 = vpop.xlane.xlu0 %545 }
 0x1c7   :  { %583 = vst.msk [vmem:[%s1522_s4 + $0x38] sm:$0xff] %vm575_vm2, %v840_v9  ;;  %v544_v43 = vpop.xlane.xlu1 %543  ;;  %v843_v44 = vtrunc.f32 %v546_v42 }
 0x1c8   :  { %582 = vst.msk [vmem:[%s1522_s4 + $0x30] sm:$0xff] %vm575_vm2, %v838_v7  ;;  %v841_v47 = vtrunc.f32 %v544_v43 }
 0x1c9   :  { %v844_v48 = vcvt.f32.s32 %v843_v44 }
 0x1ca   :  { %v842_v49 = vcvt.f32.s32 %v841_v47  ;;  %v550_v50 = vpop.xlane.xlu0 %549 }
 0x1cb   :  { %585 = vst.msk [vmem:[%s1522_s4 + $0x48] sm:$0xff] %vm575_vm2, %v844_v48  ;;  %v548_v51 = vpop.xlane.xlu1 %547  ;;  %v847_v12 = vtrunc.f32 %v550_v50 }
 0x1cc   :  { %584 = vst.msk [vmem:[%s1522_s4 + $0x40] sm:$0xff] %vm575_vm2, %v842_v49  ;;  %v845_v52 = vtrunc.f32 %v548_v51 }
 0x1cd   :  { %v848_v53 = vcvt.f32.s32 %v847_v12 }
 0x1ce   :  { %v846_v54 = vcvt.f32.s32 %v845_v52  ;;  %v554_v13 = vpop.xlane.xlu0 %553 }
 0x1cf   :  { %587 = vst.msk [vmem:[%s1522_s4 + $0x58] sm:$0xff] %vm575_vm2, %v848_v53  ;;  %v552_v55 = vpop.xlane.xlu1 %551  ;;  %v851_v56 = vtrunc.f32 %v554_v13 }
 0x1d0   :  { %586 = vst.msk [vmem:[%s1522_s4 + $0x50] sm:$0xff] %vm575_vm2, %v846_v54  ;;  %v849_v19 = vtrunc.f32 %v552_v55 }
 0x1d1   :  { %v852_v57 = vcvt.f32.s32 %v851_v56 }
 0x1d2   :  { %v850_v58 = vcvt.f32.s32 %v849_v19  ;;  %v558_v24 = vpop.xlane.xlu0 %557 }
 0x1d3   :  { %589 = vst.msk [vmem:[%s1522_s4 + $0x68] sm:$0xff] %vm575_vm2, %v852_v57  ;;  %v556_v60 = vpop.xlane.xlu1 %555  ;;  %v855_v61 = vtrunc.f32 %v558_v24 }
 0x1d4   :  { %588 = vst.msk [vmem:[%s1522_s4 + $0x60] sm:$0xff] %vm575_vm2, %v850_v58  ;;  %v853_v32 = vtrunc.f32 %v556_v60 }
 0x1d5   :  { %v856_v62 = vcvt.f32.s32 %v855_v61 }
 0x1d6   :  { %v854_v63 = vcvt.f32.s32 %v853_v32 }
 0x1d7   :  { %591 = vst.msk [vmem:[%s1522_s4 + $0x78] sm:$0xff] %vm575_vm2, %v856_v62 }
 0x1d8   :  { %590 = vst.msk [vmem:[%s1522_s4 + $0x70] sm:$0xff] %vm575_vm2, %v854_v63  ;;  %s964_s4 = smov [#allocation7]  }
 0x1d9   :  { %s597_s11 = sshll.u32 %s964_s4, 4  ;;  %s598_s11 = int_to_ptr.vmem [resolvable:$true] %s597_s11 }
 0x1da   :  { %s923_s12 = scalar_lea.vmem %s598_s11, 4096  ;;  %p928_p6 = scmp.lt.s32.totalorder %s598_s11, %s598_s11 }
 0x1db   :  { %p924_p5 = scmp.ne.s32.totalorder %s598_s11, %s923_s12  ;;  %p929_p7 = scmp.lt.s32.totalorder %s923_s12, %s923_s12 }
 0x1dd   :  { %p930_p8 = por %p929_p7, %p928_p6 }
 0x1df   :  { %p931_p9 = pnand %p930_p8, %p924_p5 }
 0x1f8   :  { %v377_v33 = vpop.f32.mrb[2].mxu0 }
 0x1f9   :  { %472 = vst [vmem:[#allocation7] sm:$0xff] %v377_v33  ;;  %v401_v45 = vpop.f32.mrb[0].mxu1  ;;  %v379_v0 = vpop.f32.mrb[3].mxu0 }
 0x1fa   :  { %480 = vst [vmem:[#allocation7 + $0x40] sm:$0xff] %v401_v45  ;;  %473 = vst [vmem:[#allocation7 + $0x8] sm:$0xff] %v379_v0  ;;  %v403_v40 = vpop.f32.mrb[1].mxu1 }
 0x1fb   :  { %481 = vst [vmem:[#allocation7 + $0x48] sm:$0xff] %v403_v40 }
 0x1fc   :  { %v383_v46 = vpop.f32.mrb[4].mxu0 }
 0x1fd   :  { %474 = vst [vmem:[#allocation7 + $0x10] sm:$0xff] %v383_v46  ;;  %v407_v1 = vpop.f32.mrb[2].mxu1  ;;  %v385_v3 = vpop.f32.mrb[5].mxu0 }
 0x1fe   :  { %482 = vst [vmem:[#allocation7 + $0x50] sm:$0xff] %v407_v1  ;;  %475 = vst [vmem:[#allocation7 + $0x18] sm:$0xff] %v385_v3  ;;  %v409_v41 = vpop.f32.mrb[3].mxu1 }
 0x1ff   :  { %483 = vst [vmem:[#allocation7 + $0x58] sm:$0xff] %v409_v41 }
 0x200   :  { %v389_v10 = vpop.f32.mrb[6].mxu0 }
 0x201   :  { %476 = vst [vmem:[#allocation7 + $0x20] sm:$0xff] %v389_v10  ;;  %v413_v11 = vpop.f32.mrb[4].mxu1  ;;  %v391_v14 = vpop.f32.mrb[7].mxu0 }
 0x202   :  { %484 = vst [vmem:[#allocation7 + $0x60] sm:$0xff] %v413_v11  ;;  %477 = vst [vmem:[#allocation7 + $0x28] sm:$0xff] %v391_v14  ;;  %v415_v15 = vpop.f32.mrb[5].mxu1 }
 0x203   :  { %485 = vst [vmem:[#allocation7 + $0x68] sm:$0xff] %v415_v15 }
 0x204   :  { %v395_v16 = vpop.f32.mrb[8].mxu0 }
 0x205   :  { %478 = vst [vmem:[#allocation7 + $0x30] sm:$0xff] %v395_v16  ;;  %v419_v17 = vpop.f32.mrb[6].mxu1  ;;  %v397_v18 = vpop.f32.mrb[9].mxu0 }
 0x206   :  { %486 = vst [vmem:[#allocation7 + $0x70] sm:$0xff] %v419_v17  ;;  %479 = vst [vmem:[#allocation7 + $0x38] sm:$0xff] %v397_v18  ;;  %v421_v20 = vpop.f32.mrb[7].mxu1 }
 0x207   :  { %487 = vst [vmem:[#allocation7 + $0x78] sm:$0xff] %v421_v20 }
 0x209   :  { %v425_v2 = vpop.f32.mrb[8].mxu1 }
 0x20a   :  { %488 = vst [vmem:[#allocation7 + $0x80] sm:$0xff] %v425_v2  ;;  %v427_v59 = vpop.f32.mrb[9].mxu1 }
 0x20b   :  { %489 = vst [vmem:[#allocation7 + $0x88] sm:$0xff] %v427_v59 }
 0x20d   :  { %v431_v21 = vpop.f32.mrb[10].mxu1 }
 0x20e   :  { %490 = vst [vmem:[#allocation7 + $0x90] sm:$0xff] %v431_v21  ;;  %v433_v22 = vpop.f32.mrb[11].mxu1 }
 0x20f   :  { %491 = vst [vmem:[#allocation7 + $0x98] sm:$0xff] %v433_v22 }
 0x211   :  { %v437_v23 = vpop.f32.mrb[12].mxu1 }
 0x212   :  { %492 = vst [vmem:[#allocation7 + $0xa0] sm:$0xff] %v437_v23  ;;  %v439_v25 = vpop.f32.mrb[13].mxu1 }
 0x213   :  { %493 = vst [vmem:[#allocation7 + $0xa8] sm:$0xff] %v439_v25 }
 0x215   :  { %v443_v26 = vpop.f32.mrb[14].mxu1 }
 0x216   :  { %494 = vst [vmem:[#allocation7 + $0xb0] sm:$0xff] %v443_v26  ;;  %v445_v27 = vpop.f32.mrb[15].mxu1 }
 0x217   :  { %495 = vst [vmem:[#allocation7 + $0xb8] sm:$0xff] %v445_v27 }
 0x219   :  { %v449_v28 = vpop.f32.mrb[16].mxu1 }
 0x21a   :  { %496 = vst [vmem:[#allocation7 + $0xc0] sm:$0xff] %v449_v28  ;;  %v451_v29 = vpop.f32.mrb[17].mxu1 }
 0x21b   :  { %497 = vst [vmem:[#allocation7 + $0xc8] sm:$0xff] %v451_v29 }
 0x21d   :  { %v455_v30 = vpop.f32.mrb[18].mxu1 }
 0x21e   :  { %498 = vst [vmem:[#allocation7 + $0xd0] sm:$0xff] %v455_v30  ;;  %v457_v31 = vpop.f32.mrb[19].mxu1 }
 0x21f   :  { %499 = vst [vmem:[#allocation7 + $0xd8] sm:$0xff] %v457_v31 }
 0x221   :  { %v461_v34 = vpop.f32.mrb[20].mxu1 }
 0x222   :  { %500 = vst [vmem:[#allocation7 + $0xe0] sm:$0xff] %v461_v34  ;;  %v463_v35 = vpop.f32.mrb[21].mxu1 }
 0x223   :  { %501 = vst [vmem:[#allocation7 + $0xe8] sm:$0xff] %v463_v35 }
 0x225   :  { %v467_v36 = vpop.f32.mrb[22].mxu1 }
 0x226   :  { %502 = vst [vmem:[#allocation7 + $0xf0] sm:$0xff] %v467_v36  ;;  %v469_v37 = vpop.f32.mrb[23].mxu1 }
 0x227   :  { %503 = vst [vmem:[#allocation7 + $0xf8] sm:$0xff] %v469_v37 }
 0x228   :  { %934 = shalt.err (!%p931_p9)
}
 0x229   :  { %s935_s2 = scalar_lea.hbm %s1521_s3, 4096 }
 0x22a   :  { %p936_p10 = scmp.ne.s32.totalorder %s1521_s3, %s935_s2  ;;  %p939_p11 = scmp.lt.u32.totalorder %s935_s2, %s1521_s3 }
 0x22c   :  { %p941_p12 = pnand %p939_p11, %p936_p10 }
 0x22e   :  { %944 = shalt.err (!%p941_p12)
}
 0x22f   :  { %603 = dma.vmem_to_hbm [thread:$0]  %s598_s11, 4096, %s1521_s3, [#allocation4], %s955_s0, %s955_s0, %s956_s13  }
 0x230   :  { %949 = dma.done.wait [#allocation4], 4096  }
 0x231   :  { %950 = vsyncadd [#allocation4], 4294963200 }
 0x232   :  { %951 = dma.done.wait [#allocation9], 16  }
 0x233   :  { %952 = vsyncadd [#allocation9], 4294967280 }
 0x234   :  { %624 = vsyncpa [#allocation3], 1 }
 0x235   :  { %625 = vsyncpa [#allocation4], 1 }
 0x236   :  { %626 = vsyncpa [#allocation9], 1 }
 0x237   :  { %627 = vsyncpa [#allocation5], 1 }

</bundles_post_ra>
